<compile_context>
chip_gen: v5e
topology: v5e:2x2
jax: 0.10.0
libtpu: 0.0.40
codegen_flags: <defaults>
</compile_context>

<pallas_src>
import numpy as np
import jax
import jax.numpy as jnp
from jax.experimental import pallas as pl
from jax.experimental.pallas import tpu as pltpu


def _round_up(n, m):
    return ((n + m - 1) // m) * m


# ----------------------------- Pallas kernel ---------------------------------

def dueling_dqn_kernel(x_ref,
                       w1_ref, b1_ref,
                       wva_ref, bva_ref,
                       w2_ref, b2_ref,
                       out_ref):
    f32 = jnp.float32
    cdt = w1_ref.dtype                      # compute dtype (bf16)

    # cast input in-kernel (no separate XLA cast/pad pass round-tripping x through HBM)
    x = x_ref[...].astype(cdt)

    # shared layer: (TB, S) @ (S, H=128) -> (TB, 128), ReLU
    h = jnp.dot(x, w1_ref[...], preferred_element_type=f32) + b1_ref[...]
    h = jnp.maximum(h, 0.0).astype(cdt)

    # fused value|advantage hidden layer: (TB, 128) @ (128, 128) -> (TB, 128), ReLU
    g = jnp.dot(h, wva_ref[...], preferred_element_type=f32) + bva_ref[...]
    g = jnp.maximum(g, 0.0).astype(cdt)

    # fused dueling head: (TB, 128) @ (128, A) -> Q = value + centered advantage
    q = jnp.dot(g, w2_ref[...], preferred_element_type=f32) + b2_ref[...]
    out_ref[...] = q.astype(out_ref.dtype)  # f32 accumulate, bf16 store


# ------------------------------- wrapper --------------------------------------

def dueling_dqn_forward(x, packed, action_size, *, tb=2048,
                        out_dtype=jnp.bfloat16, core_parallel=False):
    """x: (B, state_size) f32. packed: dict from pack_params.
    Returns (B, action_size) in out_dtype (bf16 by default to halve writeback)."""
    B, S = x.shape
    H = packed["w1"].shape[1]
    A = packed["w2"].shape[1]
    assert A == action_size

    # --- batch tiling: big default tile, re-balanced to minimize padded rows ---
    TB = min(tb, _round_up(B, 8))
    grid_b = pl.cdiv(B, TB)
    TB = _round_up(pl.cdiv(B, grid_b), 8)   # balanced tile -> pad waste < 8 rows
    Bp = grid_b * TB
    if Bp != B:
        x = jnp.pad(x, ((0, Bp - B), (0, 0)))

    # --- explicit VMEM budget (v7x: 64 MiB physical / 32 MiB scoped default) ---
    out_isz = np.dtype(out_dtype).itemsize
    weights_bytes = sum(int(v.size) * v.dtype.itemsize for v in packed.values())
    per_step_bytes = (2 * TB * S * x.dtype.itemsize       # double-buffered x tile
                      + 2 * TB * A * out_isz              # double-buffered out tile
                      + weights_bytes)                    # VMEM-resident weights
    vmem_limit = int(min(48 << 20, max(16 << 20, 2 * per_step_bytes)))

    flops = 2 * Bp * (S * H + H * 128 + 128 * A)
    bytes_accessed = int(Bp * S * x.dtype.itemsize + weights_bytes + Bp * A * out_isz)

    def weight_spec(arr):
        # constant block index -> stays VMEM-resident across grid steps (no per-step re-DMA)
        return pl.BlockSpec(arr.shape, lambda i: (0,) * arr.ndim)

    # v7x (2 TCs/chip): pass core_parallel=True to shard the batch grid axis across cores.
    dim_sem = (pltpu.CORE_PARALLEL,) if core_parallel else ("parallel",)

    q = pl.pallas_call(
        dueling_dqn_kernel,
        out_shape=jax.ShapeDtypeStruct((Bp, A), out_dtype),
        grid=(grid_b,),
        in_specs=[
            pl.BlockSpec((TB, S), lambda i: (i, 0)),
            weight_spec(packed["w1"]), weight_spec(packed["b1"]),
            weight_spec(packed["wva"]), weight_spec(packed["bva"]),
            weight_spec(packed["w2"]), weight_spec(packed["b2"]),
        ],
        out_specs=pl.BlockSpec((TB, A), lambda i: (i, 0)),
        compiler_params=pltpu.CompilerParams(
            dimension_semantics=dim_sem,
            vmem_limit_bytes=vmem_limit),
        cost_estimate=pl.CostEstimate(flops=flops, transcendentals=0,
                                      bytes_accessed=bytes_accessed),
    )(x,
      packed["w1"], packed["b1"],
      packed["wva"], packed["bva"],
      packed["w2"], packed["b2"])

    return q if Bp == B else q[:B]


# --------------------- deterministic parameter construction ------------------

def _scale_noise(key, size):
    x = jax.random.normal(key, (size,), dtype=jnp.float32)
    return jnp.sign(x) * jnp.sqrt(jnp.abs(x))


def make_noisy_linear(key, in_features, out_features, sigma_init=0.017):
    """Effective (W, b) with W of shape (in, out), matching PyTorch NoisyLinear in
    training mode: weight = weight_mu + weight_sigma * (eps_out outer eps_in)."""
    k_mu_w, k_mu_b, k_eps_in, k_eps_out = jax.random.split(key, 4)
    bound = 1.0 / (in_features ** 0.5)

    weight_mu = jax.random.uniform(k_mu_w, (out_features, in_features),
                                   minval=-bound, maxval=bound, dtype=jnp.float32)
    bias_mu = jax.random.uniform(k_mu_b, (out_features,),
                                 minval=-bound, maxval=bound, dtype=jnp.float32)
    weight_sigma = jnp.full((out_features, in_features), sigma_init, dtype=jnp.float32)
    bias_sigma = jnp.full((out_features,), sigma_init, dtype=jnp.float32)

    eps_in = _scale_noise(k_eps_in, in_features)
    eps_out = _scale_noise(k_eps_out, out_features)
    w_eff = weight_mu + weight_sigma * jnp.outer(eps_out, eps_in)   # (out, in)
    b_eff = bias_mu + bias_sigma * eps_out                          # (out,)
    return w_eff.T, b_eff.reshape(1, out_features)                  # (in, out), (1, out)


def make_params(key, state_size, action_size, hidden_dim=128):
    k1, k2, k3, k4, k5 = jax.random.split(key, 5)
    w1, b1 = make_noisy_linear(k1, state_size, hidden_dim)
    wv1, bv1 = make_noisy_linear(k2, hidden_dim, 64)
    wv2, bv2 = make_noisy_linear(k3, 64, 1)
    wa1, ba1 = make_noisy_linear(k4, hidden_dim, 64)
    wa2, ba2 = make_noisy_linear(k5, 64, action_size)
    return dict(w1=w1, b1=b1, wv1=wv1, bv1=bv1, wv2=wv2, bv2=bv2,
                wa1=wa1, ba1=ba1, wa2=wa2, ba2=ba2)


def pack_params(params, action_size, *, compute_dtype=jnp.bfloat16):
    """Fold the dueling mean into the advantage head, fuse the two streams into
    128-lane matmuls, and cast matmul operands to bf16 (biases stay f32).
    The dueling head is emitted unpadded: w2/b2 last dim == action_size."""
    f32 = jnp.float32
    A = action_size

    # fused first stream layer: [wv1 | wa1] -> (H, 128)
    wva = jnp.concatenate([params["wv1"], params["wa1"]], axis=1)
    bva = jnp.concatenate([params["bv1"], params["ba1"]], axis=1)

    # mean-centered advantage head (exact algebraic fold of Q = V + A - mean(A))
    wa2_c = params["wa2"] - params["wa2"].mean(axis=1, keepdims=True)   # (64, A)
    ba2_c = params["ba2"] - params["ba2"].mean()                        # (1, A)

    k2 = params["wv2"].shape[0]                                         # 64
    top = jnp.broadcast_to(params["wv2"], (k2, A))                      # value -> every action
    w2 = jnp.concatenate([top, wa2_c], axis=0)                          # (128, A)
    b2 = jnp.broadcast_to(params["bv2"], (1, A)) + ba2_c                # (1, A)

    return dict(
        w1=params["w1"].astype(compute_dtype),
        b1=params["b1"].astype(f32),
        wva=wva.astype(compute_dtype),
        bva=bva.astype(f32),
        w2=w2.astype(compute_dtype),
        b2=b2.astype(f32),
    )


# ------------------------------ pure-JAX reference ----------------------------

def reference_forward(x, p):
    h = jnp.maximum(x @ p["w1"] + p["b1"], 0.0)
    vh = jnp.maximum(h @ p["wv1"] + p["bv1"], 0.0)
    value = vh @ p["wv2"] + p["bv2"]
    ah = jnp.maximum(h @ p["wa1"] + p["ba1"], 0.0)
    adv = ah @ p["wa2"] + p["ba2"]
    return value + adv - adv.mean(axis=1, keepdims=True)


# ----------------------------------- main -------------------------------------

if __name__ == "__main__":
    B, STATE, ACTION, HIDDEN = 8, 16, 8, 128

    key = jax.random.PRNGKey(0)
    k_x, k_p, k_x2 = jax.random.split(key, 3)

    x = jax.random.normal(k_x, (B, STATE), dtype=jnp.float32)
    params = make_params(k_p, STATE, ACTION, HIDDEN)
    packed = pack_params(params, ACTION)

    # small batch (single grid step, no padding)
    q = jax.block_until_ready(dueling_dqn_forward(x, packed, ACTION))
    q_ref = reference_forward(x, params)
    assert q.shape == (B, ACTION)
    assert jnp.allclose(q.astype(jnp.float32), q_ref, atol=3e-2, rtol=3e-2), \
        "Pallas mismatch (small batch)"

    # larger batch with a small tile to exercise the multi-step grid + ragged pad path
    B2 = 500
    x2 = jax.random.normal(k_x2, (B2, STATE), dtype=jnp.float32)
    q2 = jax.block_until_ready(dueling_dqn_forward(x2, packed, ACTION, tb=256))
    q2_ref = reference_forward(x2, params)
    assert q2.shape == (B2, ACTION)
    assert jnp.allclose(q2.astype(jnp.float32), q2_ref, atol=3e-2, rtol=3e-2), \
        "Pallas mismatch (batched)"

    print("KERNEL_OK")
</pallas_src>

<mosaic_0001>
module attributes {stable_mosaic.version = 11 : i64} {
  func.func @dueling_dqn_kernel(%arg0: i32, %arg1: memref<8x16xf32, #tpu.memory_space<vmem>>, %arg2: memref<16x128xbf16, #tpu.memory_space<vmem>>, %arg3: memref<1x128xf32, #tpu.memory_space<vmem>>, %arg4: memref<128x128xbf16, #tpu.memory_space<vmem>>, %arg5: memref<1x128xf32, #tpu.memory_space<vmem>>, %arg6: memref<128x8xbf16, #tpu.memory_space<vmem>>, %arg7: memref<1x8xf32, #tpu.memory_space<vmem>>, %arg8: memref<8x8xbf16, #tpu.memory_space<vmem>>) attributes {dimension_semantics = [#tpu.dimension_semantics<parallel>], iteration_bounds = array<i64: 1>, scalar_prefetch = 0 : i64, scratch_operands = 0 : i64, tpu.core_type = #tpu.core_type<tc>, window_params = [{transform_indices = @transform_0, window_bounds = array<i64: 8, 16>}, {pipeline_mode = #tpu.pipeline_mode<synchronous>, transform_indices = @transform_1, window_bounds = array<i64: 16, 128>}, {pipeline_mode = #tpu.pipeline_mode<synchronous>, transform_indices = @transform_2, window_bounds = array<i64: 1, 128>}, {pipeline_mode = #tpu.pipeline_mode<synchronous>, transform_indices = @transform_3, window_bounds = array<i64: 128, 128>}, {pipeline_mode = #tpu.pipeline_mode<synchronous>, transform_indices = @transform_4, window_bounds = array<i64: 1, 128>}, {pipeline_mode = #tpu.pipeline_mode<synchronous>, transform_indices = @transform_5, window_bounds = array<i64: 128, 8>}, {pipeline_mode = #tpu.pipeline_mode<synchronous>, transform_indices = @transform_6, window_bounds = array<i64: 1, 8>}, {transform_indices = @transform_7, window_bounds = array<i64: 8, 8>}]} {
    %c0 = arith.constant 0 : index
    %c0_0 = arith.constant 0 : index
    %0 = vector.load %arg1[%c0, %c0_0] : memref<8x16xf32, #tpu.memory_space<vmem>>, vector<8x16xf32>
    %1 = arith.truncf %0 : vector<8x16xf32> to vector<8x16xbf16>
    %c0_1 = arith.constant 0 : index
    %c0_2 = arith.constant 0 : index
    %2 = vector.load %arg2[%c0_1, %c0_2] : memref<16x128xbf16, #tpu.memory_space<vmem>>, vector<16x128xbf16>
    %cst = arith.constant dense<0.000000e+00> : vector<8x128xf32>
    %3 = tpu.matmul %1, %2, %cst {dimension_numbers = #tpu.dot_dimension_numbers<[1], [0], [0], [1], [0, 0, 1, 1], [], []>} : vector<8x16xbf16>, vector<16x128xbf16>, vector<8x128xf32> -> vector<8x128xf32>
    %c0_3 = arith.constant 0 : index
    %c0_4 = arith.constant 0 : index
    %4 = vector.load %arg3[%c0_3, %c0_4] : memref<1x128xf32, #tpu.memory_space<vmem>>, vector<1x128xf32>
    %5 = vector.broadcast %4 : vector<1x128xf32> to vector<8x128xf32>
    %6 = arith.addf %3, %5 : vector<8x128xf32>
    %cst_5 = arith.constant 0.000000e+00 : f32
    %7 = vector.broadcast %cst_5 : f32 to vector<8x128xf32>
    %8 = arith.maximumf %6, %7 : vector<8x128xf32>
    %9 = arith.truncf %8 : vector<8x128xf32> to vector<8x128xbf16>
    %c0_6 = arith.constant 0 : index
    %c0_7 = arith.constant 0 : index
    %10 = vector.load %arg4[%c0_6, %c0_7] : memref<128x128xbf16, #tpu.memory_space<vmem>>, vector<128x128xbf16>
    %cst_8 = arith.constant dense<0.000000e+00> : vector<8x128xf32>
    %11 = tpu.matmul %9, %10, %cst_8 {dimension_numbers = #tpu.dot_dimension_numbers<[1], [0], [0], [1], [0, 0, 1, 1], [], []>} : vector<8x128xbf16>, vector<128x128xbf16>, vector<8x128xf32> -> vector<8x128xf32>
    %c0_9 = arith.constant 0 : index
    %c0_10 = arith.constant 0 : index
    %12 = vector.load %arg5[%c0_9, %c0_10] : memref<1x128xf32, #tpu.memory_space<vmem>>, vector<1x128xf32>
    %13 = vector.broadcast %12 : vector<1x128xf32> to vector<8x128xf32>
    %14 = arith.addf %11, %13 : vector<8x128xf32>
    %cst_11 = arith.constant 0.000000e+00 : f32
    %15 = vector.broadcast %cst_11 : f32 to vector<8x128xf32>
    %16 = arith.maximumf %14, %15 : vector<8x128xf32>
    %17 = arith.truncf %16 : vector<8x128xf32> to vector<8x128xbf16>
    %c0_12 = arith.constant 0 : index
    %c0_13 = arith.constant 0 : index
    %18 = vector.load %arg6[%c0_12, %c0_13] : memref<128x8xbf16, #tpu.memory_space<vmem>>, vector<128x8xbf16>
    %cst_14 = arith.constant dense<0.000000e+00> : vector<8x8xf32>
    %19 = tpu.matmul %17, %18, %cst_14 {dimension_numbers = #tpu.dot_dimension_numbers<[1], [0], [0], [1], [0, 0, 1, 1], [], []>} : vector<8x128xbf16>, vector<128x8xbf16>, vector<8x8xf32> -> vector<8x8xf32>
    %c0_15 = arith.constant 0 : index
    %c0_16 = arith.constant 0 : index
    %20 = vector.load %arg7[%c0_15, %c0_16] : memref<1x8xf32, #tpu.memory_space<vmem>>, vector<1x8xf32>
    %21 = vector.broadcast %20 : vector<1x8xf32> to vector<8x8xf32>
    %22 = arith.addf %19, %21 : vector<8x8xf32>
    %23 = arith.truncf %22 : vector<8x8xf32> to vector<8x8xbf16>
    %c0_17 = arith.constant 0 : index
    %c0_18 = arith.constant 0 : index
    %24 = vector.load %arg8[%c0_17, %c0_18] : memref<8x8xbf16, #tpu.memory_space<vmem>>, vector<8x8xbf16>
    tpu.vector_store %arg8[%c0_17, %c0_18], %23 {strides = array<i32>} : memref<8x8xbf16, #tpu.memory_space<vmem>>, vector<8x8xbf16>,
    return
  }
  func.func @transform_0(%arg0: i32) -> (i32, i32) {
    %c0_i32 = arith.constant 0 : i32
    %c0_i32_0 = arith.constant 0 : i32
    return %arg0, %c0_i32 : i32, i32
  }
  func.func @transform_1(%arg0: i32) -> (i32, i32) {
    %c0_i32 = arith.constant 0 : i32
    %c0_i32_0 = arith.constant 0 : i32
    %c0_i32_1 = arith.constant 0 : i32
    return %c0_i32, %c0_i32_0 : i32, i32
  }
  func.func @transform_2(%arg0: i32) -> (i32, i32) {
    %c0_i32 = arith.constant 0 : i32
    %c0_i32_0 = arith.constant 0 : i32
    %c0_i32_1 = arith.constant 0 : i32
    return %c0_i32, %c0_i32_0 : i32, i32
  }
  func.func @transform_3(%arg0: i32) -> (i32, i32) {
    %c0_i32 = arith.constant 0 : i32
    %c0_i32_0 = arith.constant 0 : i32
    %c0_i32_1 = arith.constant 0 : i32
    return %c0_i32, %c0_i32_0 : i32, i32
  }
  func.func @transform_4(%arg0: i32) -> (i32, i32) {
    %c0_i32 = arith.constant 0 : i32
    %c0_i32_0 = arith.constant 0 : i32
    %c0_i32_1 = arith.constant 0 : i32
    return %c0_i32, %c0_i32_0 : i32, i32
  }
  func.func @transform_5(%arg0: i32) -> (i32, i32) {
    %c0_i32 = arith.constant 0 : i32
    %c0_i32_0 = arith.constant 0 : i32
    %c0_i32_1 = arith.constant 0 : i32
    return %c0_i32, %c0_i32_0 : i32, i32
  }
  func.func @transform_6(%arg0: i32) -> (i32, i32) {
    %c0_i32 = arith.constant 0 : i32
    %c0_i32_0 = arith.constant 0 : i32
    %c0_i32_1 = arith.constant 0 : i32
    return %c0_i32, %c0_i32_0 : i32, i32
  }
  func.func @transform_7(%arg0: i32) -> (i32, i32) {
    %c0_i32 = arith.constant 0 : i32
    %c0_i32_0 = arith.constant 0 : i32
    return %arg0, %c0_i32 : i32, i32
  }
}

</mosaic_0001>

<bundles_post_ra>
// kernel: tpu_custom_call.1
= control target key start
LH: loop header
LB: loop body
LE: loop exit
PB: predicated region body
PF: predicated region fallthrough
CT: control target
= control target key end

     0   :  { %12 = vsyncpa [#allocation3], 0  ;;  %s559_s0 = inlined_call_operand.hbm [shape: f32[8,16], index: 0, kind: input, shape index: {}]   ;;  %s560_s1 = inlined_call_operand.hbm [shape: bf16[16,128], index: 1, kind: input, shape index: {}]   ;;  %s561_s2 = inlined_call_operand.vmem [shape: f32[1,128], index: 2, kind: input, shape index: {}]   ;;  %s562_s3 = inlined_call_operand.vmem [shape: bf16[128,128], index: 3, kind: input, shape index: {}]   ;;  %s563_s4 = inlined_call_operand.vmem [shape: f32[1,128], index: 4, kind: input, shape index: {}]   ;;  %s564_s5 = inlined_call_operand.vmem [shape: bf16[128,8], index: 5, kind: input, shape index: {}]   ;;  %s565_s6 = inlined_call_operand.vmem [shape: f32[1,8], index: 6, kind: input, shape index: {}]   ;;  %s566_s7 = inlined_call_operand.hbm [shape: bf16[8,8], index: 7, kind: output, shape index: {}]  }
   0x1   :  { %13 = vsyncpa [#allocation6], 0 }
   0x2   :  { %14 = vsyncpa [#allocation4], 0  ;;  %s20_s26 = sshll.u32 %s559_s0, 4  ;;  %s448_s27 = smov [#allocation2]   ;;  %s21_s26 = int_to_ptr.hbm [resolvable:$true] %s20_s26 }
   0x3   :  { %s22_s28 = sshll.u32 %s448_s27, 4  ;;  %s30_s8 = sshll.u32 %s560_s1, 4  ;;  %s23_s28 = int_to_ptr.vmem [resolvable:$true] %s22_s28  ;;  %s31_s8 = int_to_ptr.hbm [resolvable:$true] %s30_s8 }
   0x4   :  { %25 = dma.hbm_to_vmem [thread:$0]  %s21_s26, 128, %s23_s28, [#allocation3]  }
   0x5   :  { %s449_s9 = smov [#allocation5]   ;;  %s450_s11 = smov 64  }
   0x6   :  { %s32_s10 = sshll.u32 %s449_s9, 4  ;;  %s451_s12 = smov 4   ;;  %s33_s10 = int_to_ptr.vmem [resolvable:$true] %s32_s10 }
   0x7   :  { %38 = dma.hbm_to_vmem [thread:$0]  %s31_s8, 128, %s33_s10, [#allocation6], %s450_s11, %s450_s11, %s451_s12  }
   0x8   :  { %442 = dma.done.wait [#allocation3], 128  }
   0x9   :  { %443 = vsyncadd [#allocation3], 4294967168 }
   0xa   :  { %444 = dma.done.wait [#allocation6], 128  }
   0xb   :  { %445 = vsyncadd [#allocation6], 4294967168  ;;  %v345_v0 = vld [vmem:[#allocation5] sm:$0xff]  ;;  %v58_v1 = vld [vmem:[#allocation2] sm:$0xff]  ;;  %vm72_vm0 = vcmask 130048   ;;  %s452_s22 = smov [#allocation7]  }
   0xc   :  { %v353_v2 = vld [vmem:[%s562_s3 + $0x38] sm:$0xff]  ;;  %v59_v3 = vpack.c.bf16 %v58_v1, %v58_v1  ;;  %83 = vmatpush.bf16.msra.mxu0 %v345_v0  ;;  %v352_v4 = vld [vmem:[%s562_s3 + $0x30] sm:$0xff]  ;;  %v351_v5 = vld [vmem:[%s562_s3 + $0x28] sm:$0xff]  ;;  %s263_s23 = sshll.u32 %s452_s22, 4  ;;  %s265_s25 = sshll.u32 %s566_s7, 4  ;;  %vm256_vm1 = vcmask 60416   ;;  %s264_s23 = int_to_ptr.vmem [resolvable:$true] %s263_s23  ;;  %s266_s25 = int_to_ptr.hbm [resolvable:$true] %s265_s25 }
   0xd   :  { %159 = vmatpush.bf16.msra.mxu1 %v353_v2  ;;  %v350_v6 = vld [vmem:[%s562_s3 + $0x20] sm:$0xff]  ;;  %v349_v7 = vld [vmem:[%s562_s3 + $0x18] sm:$0xff]  ;;  %v348_v8 = vld [vmem:[%s562_s3 + $0x10] sm:$0xff] }
   0xe   :  { %v347_v9 = vld [vmem:[%s562_s3 + $0x8] sm:$0xff]  ;;  %v346_v10 = vld [vmem:[%s562_s3] sm:$0xff]  ;;  %v361_v11 = vld [vmem:[%s564_s5 + $0x38] sm:$0xff] }
   0xf   :  { %280 = vmatmul.msk.bf16.vlgmr.msra.gmra.mxu0 %vm72_vm0, %v59_v3  ;;  %242 = vmatpush.bf16.msra.mxu2 %v361_v11  ;;  %v360_v12 = vld [vmem:[%s564_s5 + $0x30] sm:$0xff]  ;;  %v359_v13 = vld [vmem:[%s564_s5 + $0x28] sm:$0xff]  ;;  %v358_v14 = vld [vmem:[%s564_s5 + $0x20] sm:$0xff] }
  0x10   :  { %v357_v15 = vld [vmem:[%s564_s5 + $0x18] sm:$0xff]  ;;  %v356_v16 = vld [vmem:[%s564_s5 + $0x10] sm:$0xff]  ;;  %v367_v17 = vld [vmem:[%s561_s2] ss:$0 sm:$0xff] }
  0x11   :  { %160 = vmatpush.bf16.msra.mxu1 %v352_v4  ;;  %v355_v23 = vld [vmem:[%s564_s5 + $0x8] sm:$0xff]  ;;  %v354_v24 = vld [vmem:[%s564_s5] sm:$0xff] }
  0x12   :  { %v368_v25 = vld [vmem:[%s563_s4] ss:$0 sm:$0xff] }
  0x13   :  { %243 = vmatpush.bf16.msra.mxu2 %v360_v12  ;;  %v369_v31 = vld [vmem:[%s565_s6] ss:$0 sm:$0xff] }
  0x15   :  { %161 = vmatpush.bf16.msra.mxu1 %v351_v5 }
  0x17   :  { %244 = vmatpush.bf16.msra.mxu2 %v359_v13 }
  0x19   :  { %162 = vmatpush.bf16.msra.mxu1 %v350_v6 }
  0x1b   :  { %245 = vmatpush.bf16.msra.mxu2 %v358_v14 }
  0x1d   :  { %163 = vmatpush.bf16.msra.mxu1 %v349_v7 }
  0x1f   :  { %246 = vmatpush.bf16.msra.mxu2 %v357_v15 }
  0x21   :  { %164 = vmatpush.bf16.msra.mxu1 %v348_v8 }
  0x23   :  { %247 = vmatpush.bf16.msra.mxu2 %v356_v16 }
  0x25   :  { %165 = vmatpush.bf16.msra.mxu1 %v347_v9 }
  0x27   :  { %248 = vmatpush.bf16.msra.mxu2 %v355_v23 }
  0x29   :  { %166 = vmatpush.bf16.msra.mxu1 %v346_v10 }
  0x2b   :  { %249 = vmatpush.bf16.msra.mxu2 %v354_v24 }
  0x8c   :  { %v85_v18 = vpop.f32.mrf.mxu0 }
  0x8d   :  { %v86_v19 = vadd.f32 %v367_v17, %v85_v18 }
  0x8f   :  { %v89_v20 = vmax.f32 %v86_v19, 0.0 }
  0x91   :  { %v90_v21 = vpack.c.bf16 %v89_v20, %v89_v20 }
  0x93   :  { %167 = vmatmul.bf16.vlgmr.msra.gmra.mxu1 %v90_v21 }
  0x94   :  { %v87_v22 = vpop.f32.mrf.mxu0 }
 0x110   :  { %v168_v26 = vpop.f32.mrf.mxu1 }
 0x111   :  { %v169_v27 = vadd.f32 %v368_v25, %v168_v26 }
 0x113   :  { %v172_v28 = vmax.f32 %v169_v27, 0.0 }
 0x115   :  { %v173_v29 = vpack.c.bf16 %v172_v28, %v172_v28 }
 0x117   :  { %250 = vmatmul.bf16.vlgmr.msra.gmra.mxu2 %v173_v29 }
 0x118   :  { %v170_v30 = vpop.f32.mrf.mxu1 }
 0x19a   :  { %v251_v32 = vpop.f32.mrf.mxu2 }
 0x19b   :  { %v252_v33 = vadd.f32 %v369_v31, %v251_v32 }
 0x19d   :  { %v255_v34 = vpack.c.bf16 %v252_v33, %v252_v33 }
 0x19f   :  { %257 = vst.msk [vmem:[#allocation7] sm:$0xf] %vm256_vm1, %v255_v34 }
 0x1a0   :  { %268 = dma.vmem_to_hbm [thread:$0]  %s264_s23, 64, %s266_s25, [#allocation4]  }
 0x1a2   :  { %v253_v35 = vpop.f32.mrf.mxu2 }
 0x1a3   :  { %446 = dma.done.wait [#allocation4], 64  }
 0x1a4   :  { %447 = vsyncadd [#allocation4], 4294967232 }
 0x1a5   :  { %273 = vsyncpa [#allocation3], 1 }
 0x1a6   :  { %274 = vsyncpa [#allocation6], 1 }
 0x1a7   :  { %275 = vsyncpa [#allocation4], 1 }

</bundles_post_ra>
